<compile_context>
chip_gen: v6e
topology: v6e:2x2x1
jax: 0.10.0
libtpu: 0.0.40
codegen_flags: <defaults>
</compile_context>

<pallas_src>
import functools

import jax
import jax.numpy as jnp
from jax.experimental import pallas as pl
from jax.experimental.pallas import tpu as pltpu


def _round_up(v, m):
    return ((v + m - 1) // m) * m


def _gated_attn_kernel(x_ref, wab_ref, bab_ref, wc_ref, bc_ref, a_out_ref, *,
                       d_pad, vpu_proj):
    # x_ref:   [TN, L]      native dtype (e.g. f32); cast to bf16 here
    # wab_ref: [L, 2*Dp]    bf16 fused [Wa^T | 0.5*Wb^T], zero-padded D -> Dp
    # bab_ref: [1, 2*Dp]    f32  fused [ba   | 0.5*bb  ], zero-padded
    # wc_ref:  [1, Dp] f32  (vpu_proj path, C == 1)  or  [Dp, C] bf16 (MXU path)
    # bc_ref:  [1, C]       f32
    # a_out:   [TN, C]
    x = x_ref[...].astype(wab_ref.dtype)          # in-kernel cast (under DMA)

    # One fused MXU matmul for both branches; accumulate in f32; single
    # broadcast bias add on the fused accumulator.
    ab = jnp.dot(x, wab_ref[...], preferred_element_type=jnp.float32)  # [TN,2Dp]
    ab = ab + bab_ref[...]

    # Both non-linearities via one fused tanh stream:
    #   sigmoid(z) = 0.5*(tanh(z/2)+1), the 0.5 pre-scale lives in Wb/bb.
    t = jnp.tanh(ab)                              # [TN, 2*Dp]
    a = t[:, :d_pad]                              # tanh branch
    b = 0.5 * t[:, d_pad:] + 0.5                  # sigmoid branch
    gated = a * b                                 # padded cols are exactly 0

    if vpu_proj:
        # C == 1: keep the tiny projection off the MXU (VPU mul + XLU reduce).
        A = jnp.sum(gated * wc_ref[...], axis=-1, keepdims=True) + bc_ref[...]
    else:
        A = jnp.dot(gated.astype(wc_ref.dtype), wc_ref[...],
                    preferred_element_type=jnp.float32) + bc_ref[...]
    a_out_ref[...] = A.astype(a_out_ref.dtype)


def _choose_tile_n(N, block_n):
    """Divisor-aware row tile: near-full last tile, >=2 grid steps when it
    is worth it (v7x megacore), sublane/MXU friendly sizes."""
    if N <= 512:
        return _round_up(max(N, 8), 8)
    tiles = max(2, pl.cdiv(N, block_n))
    return min(_round_up(pl.cdiv(N, tiles), 256), _round_up(N, 256))


def attn_net_gated_forward(x, wa, ba, wb, bb, wc, bc, *,
                           block_n=2048, compute_dtype=jnp.bfloat16):
    """Gated-attention forward.

    x: [N, L]; wa/wb: [D, L]; ba/bb: [D]; wc: [C, D]; bc: [C].
    Returns (A, x) with A: [N, C], matching the PyTorch module.
    """
    N, L = x.shape
    D = wa.shape[0]
    C = wc.shape[0]
    out_dtype = x.dtype

    # ---- weight-only prep (tiny arrays; x itself is passed through) ----
    Dp = _round_up(D, 128)                        # lane-align each branch
    wab = jnp.zeros((L, 2 * Dp), dtype=compute_dtype)
    wab = wab.at[:, :D].set(wa.T.astype(compute_dtype))
    wab = wab.at[:, Dp:Dp + D].set((0.5 * wb.T).astype(compute_dtype))
    bab = jnp.zeros((1, 2 * Dp), dtype=jnp.float32)
    bab = bab.at[0, :D].set(ba.astype(jnp.float32))
    bab = bab.at[0, Dp:Dp + D].set(0.5 * bb.astype(jnp.float32))
    bc2 = bc.reshape(1, C).astype(jnp.float32)

    vpu_proj = (C == 1)
    if vpu_proj:
        wc_in = jnp.zeros((1, Dp), jnp.float32).at[0, :D].set(
            wc[0].astype(jnp.float32))
    else:
        wc_in = jnp.zeros((Dp, C), compute_dtype).at[:D, :].set(
            wc.T.astype(compute_dtype))

    # ---- tiling over N (ragged tail handled by Pallas partial blocks) ----
    TN = _choose_tile_n(N, block_n)
    grid = (pl.cdiv(N, TN),)

    kernel = functools.partial(_gated_attn_kernel, d_pad=Dp, vpu_proj=vpu_proj)

    x_bytes = jnp.dtype(x.dtype).itemsize
    cost = pl.CostEstimate(
        flops=2 * N * L * (2 * Dp) + 2 * N * Dp * C + 5 * N * Dp,
        transcendentals=2 * N * Dp,
        bytes_accessed=(N * L * x_bytes
                        + N * C * jnp.dtype(out_dtype).itemsize
                        + wab.size * 2 + bab.size * 4
                        + wc_in.size * 4 + bc2.size * 4),
    )

    A = pl.pallas_call(
        kernel,
        out_shape=jax.ShapeDtypeStruct((N, C), out_dtype),
        grid=grid,
        in_specs=[
            pl.BlockSpec((TN, L), lambda i: (i, 0)),        # x: streamed tiles
            pl.BlockSpec((L, 2 * Dp), lambda i: (0, 0)),    # fused Wa|Wb (resident)
            pl.BlockSpec((1, 2 * Dp), lambda i: (0, 0)),    # fused bias (resident)
            pl.BlockSpec(wc_in.shape, lambda i: (0, 0)),    # final proj weight
            pl.BlockSpec((1, C), lambda i: (0, 0)),         # bc
        ],
        out_specs=pl.BlockSpec((TN, C), lambda i: (i, 0)),
        compiler_params=pltpu.CompilerParams(
            dimension_semantics=("parallel",),              # megacore on v7x
            vmem_limit_bytes=48 * 1024 * 1024,              # fits v7x's 64 MiB
        ),
        cost_estimate=cost,
    )(x, wab, bab, wc_in, bc2)

    return A, x


def _reference(x, wa, ba, wb, bb, wc, bc):
    a = jnp.tanh(x @ wa.T + ba)
    b = jax.nn.sigmoid(x @ wb.T + bb)
    return (a * b) @ wc.T + bc


if __name__ == "__main__":
    # Small shapes consistent with the module: L=32, D=16, n_classes=1, N=8.
    N, L, D, C = 8, 32, 16, 1

    key = jax.random.PRNGKey(0)
    kx, ka, kab, kb, kbb, kc, kcb = jax.random.split(key, 7)

    x = jax.random.normal(kx, (N, L), dtype=jnp.float32)
    # nn.Linear parameter shapes: W [out, in], b [out].
    wa = jax.random.normal(ka, (D, L), dtype=jnp.float32) * 0.05
    ba = jax.random.normal(kab, (D,), dtype=jnp.float32) * 0.05
    wb = jax.random.normal(kb, (D, L), dtype=jnp.float32) * 0.05
    bb = jax.random.normal(kbb, (D,), dtype=jnp.float32) * 0.05
    wc = jax.random.normal(kc, (C, D), dtype=jnp.float32) * 0.05
    bc = jax.random.normal(kcb, (C,), dtype=jnp.float32) * 0.05

    A, x_out = attn_net_gated_forward(x, wa, ba, wb, bb, wc, bc)
    jax.block_until_ready((A, x_out))

    A_ref = _reference(x, wa, ba, wb, bb, wc, bc)
    assert A.shape == (N, C)
    assert x_out.shape == (N, L)
    # bf16 x/weight compute stream (f32 accumulation) -> modest tolerance.
    assert jnp.allclose(A, A_ref, atol=1e-2, rtol=1e-2), (
        f"max abs err {jnp.max(jnp.abs(A - A_ref))}")
    assert jnp.array_equal(x_out, x)

    print("KERNEL_OK")
</pallas_src>

<mosaic_0001>
module attributes {stable_mosaic.version = 11 : i64} {
  func.func @_gated_attn_kernel(%arg0: i32, %arg1: memref<8x32xf32, #tpu.memory_space<vmem>>, %arg2: memref<32x256xbf16, #tpu.memory_space<vmem>>, %arg3: memref<1x256xf32, #tpu.memory_space<vmem>>, %arg4: memref<1x128xf32, #tpu.memory_space<vmem>>, %arg5: memref<1x1xf32, #tpu.memory_space<vmem>>, %arg6: memref<8x1xf32, #tpu.memory_space<vmem>>) attributes {dimension_semantics = [#tpu.dimension_semantics<parallel>], iteration_bounds = array<i64: 1>, scalar_prefetch = 0 : i64, scratch_operands = 0 : i64, tpu.core_type = #tpu.core_type<tc>, window_params = [{transform_indices = @transform_0, window_bounds = array<i64: 8, 32>}, {pipeline_mode = #tpu.pipeline_mode<synchronous>, transform_indices = @transform_1, window_bounds = array<i64: 32, 256>}, {pipeline_mode = #tpu.pipeline_mode<synchronous>, transform_indices = @transform_2, window_bounds = array<i64: 1, 256>}, {pipeline_mode = #tpu.pipeline_mode<synchronous>, transform_indices = @transform_3, window_bounds = array<i64: 1, 128>}, {pipeline_mode = #tpu.pipeline_mode<synchronous>, transform_indices = @transform_4, window_bounds = array<i64: 1, 1>}, {transform_indices = @transform_5, window_bounds = array<i64: 8, 1>}]} {
    %c0 = arith.constant 0 : index
    %c0_0 = arith.constant 0 : index
    %0 = vector.load %arg1[%c0, %c0_0] : memref<8x32xf32, #tpu.memory_space<vmem>>, vector<8x32xf32>
    %1 = arith.truncf %0 : vector<8x32xf32> to vector<8x32xbf16>
    %c0_1 = arith.constant 0 : index
    %c0_2 = arith.constant 0 : index
    %2 = vector.load %arg2[%c0_1, %c0_2] : memref<32x256xbf16, #tpu.memory_space<vmem>>, vector<32x256xbf16>
    %cst = arith.constant dense<0.000000e+00> : vector<8x256xf32>
    %3 = tpu.matmul %1, %2, %cst {dimension_numbers = #tpu.dot_dimension_numbers<[1], [0], [0], [1], [0, 0, 1, 1], [], []>} : vector<8x32xbf16>, vector<32x256xbf16>, vector<8x256xf32> -> vector<8x256xf32>
    %c0_3 = arith.constant 0 : index
    %c0_4 = arith.constant 0 : index
    %4 = vector.load %arg3[%c0_3, %c0_4] : memref<1x256xf32, #tpu.memory_space<vmem>>, vector<1x256xf32>
    %5 = vector.broadcast %4 : vector<1x256xf32> to vector<8x256xf32>
    %6 = arith.addf %3, %5 : vector<8x256xf32>
    %7 = math.tanh %6 : vector<8x256xf32>
    %8 = vector.extract_strided_slice %7 {offsets = [0, 0], sizes = [8, 128], strides = [1, 1]} : vector<8x256xf32> to vector<8x128xf32>
    %9 = vector.extract_strided_slice %7 {offsets = [0, 128], sizes = [8, 128], strides = [1, 1]} : vector<8x256xf32> to vector<8x128xf32>
    %cst_5 = arith.constant 5.000000e-01 : f32
    %10 = vector.broadcast %cst_5 : f32 to vector<8x128xf32>
    %11 = arith.mulf %10, %9 : vector<8x128xf32>
    %cst_6 = arith.constant 5.000000e-01 : f32
    %12 = vector.broadcast %cst_6 : f32 to vector<8x128xf32>
    %13 = arith.addf %11, %12 : vector<8x128xf32>
    %14 = arith.mulf %8, %13 : vector<8x128xf32>
    %c0_7 = arith.constant 0 : index
    %c0_8 = arith.constant 0 : index
    %15 = vector.load %arg4[%c0_7, %c0_8] : memref<1x128xf32, #tpu.memory_space<vmem>>, vector<1x128xf32>
    %16 = vector.broadcast %15 : vector<1x128xf32> to vector<8x128xf32>
    %17 = arith.mulf %14, %16 : vector<8x128xf32>
    %cst_9 = arith.constant dense<0.000000e+00> : vector<8xf32>
    %18 = vector.multi_reduction <add>, %17, %cst_9 [1] : vector<8x128xf32> to vector<8xf32>
    %19 = vector.shape_cast %18 : vector<8xf32> to vector<8x1xf32>
    %c0_10 = arith.constant 0 : index
    %c0_11 = arith.constant 0 : index
    %20 = vector.load %arg5[%c0_10, %c0_11] : memref<1x1xf32, #tpu.memory_space<vmem>>, vector<1x1xf32>
    %21 = vector.broadcast %20 : vector<1x1xf32> to vector<8x1xf32>
    %22 = arith.addf %19, %21 : vector<8x1xf32>
    %c0_12 = arith.constant 0 : index
    %c0_13 = arith.constant 0 : index
    %23 = vector.load %arg6[%c0_12, %c0_13] : memref<8x1xf32, #tpu.memory_space<vmem>>, vector<8x1xf32>
    tpu.vector_store %arg6[%c0_12, %c0_13], %22 {strides = array<i32>} : memref<8x1xf32, #tpu.memory_space<vmem>>, vector<8x1xf32>,
    return
  }
  func.func @transform_0(%arg0: i32) -> (i32, i32) {
    %c0_i32 = arith.constant 0 : i32
    %c0_i32_0 = arith.constant 0 : i32
    return %arg0, %c0_i32 : i32, i32
  }
  func.func @transform_1(%arg0: i32) -> (i32, i32) {
    %c0_i32 = arith.constant 0 : i32
    %c0_i32_0 = arith.constant 0 : i32
    %c0_i32_1 = arith.constant 0 : i32
    return %c0_i32, %c0_i32_0 : i32, i32
  }
  func.func @transform_2(%arg0: i32) -> (i32, i32) {
    %c0_i32 = arith.constant 0 : i32
    %c0_i32_0 = arith.constant 0 : i32
    %c0_i32_1 = arith.constant 0 : i32
    return %c0_i32, %c0_i32_0 : i32, i32
  }
  func.func @transform_3(%arg0: i32) -> (i32, i32) {
    %c0_i32 = arith.constant 0 : i32
    %c0_i32_0 = arith.constant 0 : i32
    %c0_i32_1 = arith.constant 0 : i32
    return %c0_i32, %c0_i32_0 : i32, i32
  }
  func.func @transform_4(%arg0: i32) -> (i32, i32) {
    %c0_i32 = arith.constant 0 : i32
    %c0_i32_0 = arith.constant 0 : i32
    %c0_i32_1 = arith.constant 0 : i32
    return %c0_i32, %c0_i32_0 : i32, i32
  }
  func.func @transform_5(%arg0: i32) -> (i32, i32) {
    %c0_i32 = arith.constant 0 : i32
    %c0_i32_0 = arith.constant 0 : i32
    return %arg0, %c0_i32 : i32, i32
  }
}

</mosaic_0001>

<bundles_post_ra>
// kernel: tpu_custom_call.1
= control target key start
LH: loop header
LB: loop body
LE: loop exit
PB: predicated region body
PF: predicated region fallthrough
CT: control target
= control target key end

     0   :  { %s282_s0 = inlined_call_operand.hbm [shape: f32[8,32], index: 0, kind: input, shape index: {}]   ;;  %s283_s1 = inlined_call_operand.hbm [shape: bf16[32,256], index: 1, kind: input, shape index: {}]   ;;  %s284_s2 = inlined_call_operand.vmem [shape: f32[1,256], index: 2, kind: input, shape index: {}]   ;;  %s285_s3 = inlined_call_operand.vmem [shape: f32[1,128], index: 3, kind: input, shape index: {}]   ;;  %s286_s4 = inlined_call_operand.<no memory space> [shape: f32[1,1], index: 4, kind: input, shape index: {}]   ;;  %s287_s5 = inlined_call_operand.vmem [shape: f32[8,1], index: 5, kind: output, shape index: {}]  }
   0x1   :  { %v10_v0 = vstv %s286_s4 }
   0x2   :  { %11 = vst [vmem:[#allocation2] sm:$0x1] %v10_v0 }
   0x3   :  { %12 = vsyncpa [#allocation4], 0 }
   0x4   :  { %13 = vsyncpa [#allocation6], 0  ;;  %s229_s20 = smov [#allocation3]   ;;  %s230_s22 = smov [#allocation5]  }
   0x5   :  { %s20_s21 = sshll.u32 %s229_s20, 4  ;;  %s29_s23 = sshll.u32 %s230_s22, 4  ;;  %s21_s21 = int_to_ptr.vmem [resolvable:$true] %s20_s21  ;;  %s30_s23 = int_to_ptr.vmem [resolvable:$true] %s29_s23 }
   0x6   :  { %s193_s24 = scalar_lea.vmem %s21_s21, 128  ;;  %p198_p1 = scmp.lt.s32.totalorder %s21_s21, %s21_s21 }
   0x7   :  { %p194_p0 = scmp.ne.s32.totalorder %s21_s21, %s193_s24  ;;  %p199_p2 = scmp.lt.s32.totalorder %s193_s24, %s193_s24 }
   0x9   :  { %p200_p3 = por %p199_p2, %p198_p1 }
   0xb   :  { %p201_p4 = pnand %p200_p3, %p194_p0 }
   0xd   :  { %204 = shalt.err (!%p201_p4)
}
   0xe   :  { %23 = dma.hbm_to_vmem [thread:$0]  %s282_s0, 128, %s21_s21, [#allocation4]  }
   0xf   :  { %s213_s4 = scalar_lea.vmem %s30_s23, 512  ;;  %p218_p6 = scmp.lt.s32.totalorder %s30_s23, %s30_s23 }
  0x10   :  { %p214_p5 = scmp.ne.s32.totalorder %s30_s23, %s213_s4  ;;  %p219_p7 = scmp.lt.s32.totalorder %s213_s4, %s213_s4 }
  0x12   :  { %p220_p8 = por %p219_p7, %p218_p6 }
  0x14   :  { %p221_p9 = pnand %p220_p8, %p214_p5 }
  0x16   :  { %224 = shalt.err (!%p221_p9)
}
  0x17   :  { %s231_s27 = smov 128   ;;  %s232_s28 = smov 8  }
  0x18   :  { %35 = dma.hbm_to_vmem [thread:$0]  %s283_s1, 512, %s30_s23, [#allocation6], %s231_s27, %s231_s27, %s232_s28  }
  0x19   :  { %225 = dma.done.wait [#allocation4], 128  }
  0x1a   :  { %226 = vsyncadd [#allocation4], 4294967168 }
  0x1b   :  { %227 = dma.done.wait [#allocation6], 512  }
  0x1c   :  { %228 = vsyncadd [#allocation6], 4294966784  ;;  %v233_v1 = vmov 0   ;;  %v175_v2 = vld [vmem:[#allocation5 + $0x14] ss:$8 sps:$4 sm:$0xff]   ;;  %vm87_vm0 = vcmask 261120   ;;  %v57_v8 = vlaneseq }
  0x1d   :  { %123 = vmatprep.mubr.bf16.mxu0 %v233_v1  ;;  %v177_v3 = vld [vmem:[#allocation5 + $0x10] ss:$8 sps:$4 sm:$0xff]   ;;  %103 = vmatprep.subr.bf16.mxu0 %v175_v2  ;;  %v178_v4 = vld [vmem:[#allocation5 + $0x4] ss:$8 sps:$4 sm:$0xff]   ;;  %v180_v5 = vld [vmem:[#allocation5] ss:$8 sps:$4 sm:$0xff]  }
  0x1e   :  { %104 = vmatpush1.bf16.msra.mxu0 %v177_v3  ;;  %v49_v6 = vld [vmem:[#allocation3] sm:$0xff]  ;;  %v58_v9 = vshrl.u32 %v57_v8, 7  ;;  %v168_v25 = vld [vmem:[%s285_s3] ss:$0 sm:$0xff]  ;;  %vm155_vm1 = vcmask 7168  }
  0x1f   :  { %105 = vmatprep.subr.bf16.mxu0 %v178_v4  ;;  %v50_v7 = vpack.c.bf16 %v49_v6, %v49_v6  ;;  %v55_v12 = vld [vmem:[%s284_s2] sm:$0x3] }
  0x20   :  { %v63_v10 = vsub.s32 1, %v58_v9  ;;  %v59_v11 = vsub.s32 0, %v58_v9  ;;  %v169_v28 = vld [vmem:[#allocation2] ss:$0 sm:$0xff] }
  0x22   :  { %106 = vmatpush1.bf16.msra.mxu0 %v180_v5  ;;  %v64_v13 = vrot.slane %v55_v12, %v63_v10  ;;  %v60_v15 = vrot.slane %v55_v12, %v59_v11 }
  0x25   :  { %167 = vmatmul.mubr.msk.bf16.vlgmr.msra.gmra.mxu0 %vm87_vm0, %v50_v7 }
  0xe5   :  { %v125_v14 = vpop.f32.mrf.mxu0 }
  0xe6   :  { %v126_v19 = vadd.f32 %v125_v14, %v60_v15 }
  0xe7   :  { %v127_v16 = vpop.f32.mrf.mxu0 }
  0xe8   :  { %v128_v17 = vadd.f32 %v127_v16, %v64_v13 }
  0xe9   :  { %v129_v18 = vpop.f32.mrf.mxu0 }
  0xea   :  { %181 = vtanh.f32 %v128_v17 }
  0xeb   :  { %v130_v20 = vpop.f32.mrf.mxu0  ;;  %183 = vtanh.f32 %v126_v19 }
  0xf7   :  { %v182_v21 = vpop.eup %181 }
  0xf8   :  { %v134_v22 = vmul.f32 0.5, %v182_v21  ;;  %v184_v24 = vpop.eup %183 }
  0xfa   :  { %v135_v23 = vadd.f32 0.5, %v134_v22 }
  0xfc   :  { %v136_v26 = vmul.f32 %v184_v24, %v135_v23 }
  0xfe   :  { %v144_v27 = vmul.f32 %v168_v25, %v136_v26 }
 0x100   :  { %145 = vadd.xlane.f32.xlu0 %v144_v27 }
 0x189   :  { %v146_v29 = vpop.xlane.xlu0 %145 }
 0x18a   :  { %v154_v30 = vadd.f32 %v169_v28, %v146_v29 }
 0x18c   :  { %156 = vst.msk [vmem:[%s287_s5] sm:$0xff] %vm155_vm1, %v154_v30 }
 0x18d   :  { %161 = vsyncpa [#allocation4], 1 }
 0x18e   :  { %162 = vsyncpa [#allocation6], 1 }

</bundles_post_ra>
